<compile_context>
chip_gen: v6e
topology: v6e:2x2x1
jax: 0.10.0
libtpu: 0.0.40
codegen_flags: <defaults>
</compile_context>

<pallas_src>
import functools

import jax
import jax.numpy as jnp
from jax import lax
from jax.experimental import pallas as pl
from jax.experimental.pallas import tpu as pltpu

LANES = 128
SUBLANES = 8
BLOCK_ROWS = 8192                 # (8192, 128) f32 = 4 MiB per input block per step
ACC_ROWS_WIDE = 64                # 8 accumulator vregs -> short VPU add chains
VMEM_LIMIT_BYTES = 32 * 1024 * 1024


def _charbonnier_kernel(x_ref, y_ref, out_ref, *, eps, rows_valid, block_rows,
                        blocks_per_core, num_blocks, acc_rows, needs_mask):
    c = pl.program_id(0)          # core (parallel) axis
    i = pl.program_id(1)          # reduction (arbitrary) axis

    @pl.when(i == 0)
    def _():
        out_ref[...] = jnp.zeros_like(out_ref)

    d = x_ref[...].astype(jnp.float32) - y_ref[...].astype(jnp.float32)
    v = jnp.sqrt(d * d + eps)     # sqrt -> EUP, adds -> VPU: hidden under DMA

    def _accumulate(vals):
        # (block_rows, 128) -> (acc_rows, 128) partial sums: pure vreg-aligned
        # VPU adds (no XLU), chain depth block_rows // acc_rows per step.
        out_ref[...] += vals.reshape(-1, acc_rows, LANES).sum(axis=0)[None]

    if needs_mask:
        global_block = c * blocks_per_core + i

        # Only the last real block (possibly partial) and the clamped duplicate
        # block on the last core can contain invalid rows.
        @pl.when(global_block >= num_blocks - 1)
        def _():
            row0 = global_block * block_rows
            row_idx = lax.broadcasted_iota(jnp.int32, v.shape, 0) + row0
            # keep as a select so NaN/garbage from out-of-range reads is dropped
            _accumulate(jnp.where(row_idx < rows_valid, v, 0.0))

        @pl.when(global_block < num_blocks - 1)
        def _():
            _accumulate(v)
    else:
        _accumulate(v)


def _charbonnier_ref_f32(x, y, eps):
    d = x.astype(jnp.float32) - y.astype(jnp.float32)
    return jnp.sum(jnp.sqrt(d * d + eps))


@functools.partial(jax.jit, static_argnames=("eps", "block_rows"))
def charbonnier_loss(x, y, eps=1e-06, block_rows=BLOCK_ROWS):
    """Charbonnier loss, exact semantics of the PyTorch module's forward."""
    assert x.shape == y.shape, "x and y must have the same shape"
    n = int(x.size)
    eps = float(eps)

    xf = jnp.ravel(x)
    yf = jnp.ravel(y)

    bulk = (n // LANES) * LANES           # 128-aligned bulk handled by the kernel
    tail = n - bulk

    loss = jnp.zeros((), jnp.float32)
    if tail:
        # < 128 leftover elements: tiny pure-JAX reduction instead of padding
        # (and re-reading/re-writing) the whole array.
        loss = loss + _charbonnier_ref_f32(xf[bulk:], yf[bulk:], eps)

    if bulk == 0:
        return loss

    rows = bulk // LANES
    if bulk == n:
        x2 = xf.reshape(rows, LANES)      # free reshape, zero extra HBM traffic
        y2 = yf.reshape(rows, LANES)
    else:
        x2 = xf[:bulk].reshape(rows, LANES)
        y2 = yf[:bulk].reshape(rows, LANES)

    block_rows = min(int(block_rows), rows)
    acc_rows = SUBLANES
    for cand in (ACC_ROWS_WIDE, 32, 16, 8, 4, 2, 1):
        if block_rows % cand == 0:
            acc_rows = cand
            break

    num_blocks = -(-rows // block_rows)
    cores = 2 if num_blocks >= 2 else 1   # split reduction across TCs (v7x)
    bpc = -(-num_blocks // cores)         # blocks per core
    needs_mask = (cores * bpc * block_rows) != rows

    if cores * bpc == num_blocks:
        def in_map(c, i):
            return (c * bpc + i, 0)
    else:
        # Clamp so the one extra step on the last core never issues a fully
        # out-of-bounds DMA; its contribution is masked to zero in-kernel.
        def in_map(c, i):
            return (jnp.minimum(c * bpc + i, num_blocks - 1), 0)

    kernel = functools.partial(
        _charbonnier_kernel,
        eps=eps,
        rows_valid=int(rows),
        block_rows=int(block_rows),
        blocks_per_core=int(bpc),
        num_blocks=int(num_blocks),
        acc_rows=int(acc_rows),
        needs_mask=bool(needs_mask),
    )

    partials = pl.pallas_call(
        kernel,
        out_shape=jax.ShapeDtypeStruct((cores, acc_rows, LANES), jnp.float32),
        grid_spec=pltpu.PrefetchScalarGridSpec(
            num_scalar_prefetch=0,
            grid=(cores, bpc),
            in_specs=[
                pl.BlockSpec((block_rows, LANES), in_map),
                pl.BlockSpec((block_rows, LANES), in_map),
            ],
            out_specs=pl.BlockSpec((1, acc_rows, LANES), lambda c, i: (c, 0, 0)),
        ),
        compiler_params=pltpu.CompilerParams(
            dimension_semantics=("parallel", "arbitrary"),
            vmem_limit_bytes=VMEM_LIMIT_BYTES,
        ),
    )(x2, y2)

    # Final reduction of the small per-core partial slabs (trivially cheap).
    return loss + jnp.sum(partials)


if __name__ == "__main__":
    key = jax.random.PRNGKey(0)
    kx, ky = jax.random.split(key)

    # NCHW like the PyTorch module's typical SR inputs (128-aligned size).
    x = jax.random.uniform(kx, (2, 4, 16, 16), dtype=jnp.float32)
    y = jax.random.uniform(ky, (2, 4, 16, 16), dtype=jnp.float32)
    loss = charbonnier_loss(x, y, eps=1e-06)
    jax.block_until_ready(loss)
    ref = _charbonnier_ref_f32(x, y, 1e-06)
    assert jnp.allclose(loss, ref, rtol=1e-5, atol=1e-4), (loss, ref)

    # Unaligned size: kernel over the 128-aligned bulk + pure-JAX tail.
    xb = jax.random.uniform(kx, (1, 3, 17, 19), dtype=jnp.float32)
    yb = jax.random.uniform(ky, (1, 3, 17, 19), dtype=jnp.float32)
    loss_b = charbonnier_loss(xb, yb, eps=1e-06)
    jax.block_until_ready(loss_b)
    ref_b = _charbonnier_ref_f32(xb, yb, 1e-06)
    assert jnp.allclose(loss_b, ref_b, rtol=1e-5, atol=1e-4), (loss_b, ref_b)

    # Small block_rows to force the multi-block, two-core grid with the clamped
    # index_map, partial-block masking and the tail path — all at a small size.
    xc = jax.random.uniform(kx, (1, 3, 43, 44), dtype=jnp.float32)
    yc = jax.random.uniform(ky, (1, 3, 43, 44), dtype=jnp.float32)
    loss_c = charbonnier_loss(xc, yc, eps=1e-06, block_rows=16)
    jax.block_until_ready(loss_c)
    ref_c = _charbonnier_ref_f32(xc, yc, 1e-06)
    assert jnp.allclose(loss_c, ref_c, rtol=1e-5, atol=1e-4), (loss_c, ref_c)

    print("KERNEL_OK")
</pallas_src>

<mosaic_0001>
module attributes {stable_mosaic.version = 11 : i64} {
  func.func @_charbonnier_kernel(%arg0: i32, %arg1: i32, %arg2: memref<16x128xf32, #tpu.memory_space<vmem>>, %arg3: memref<16x128xf32, #tpu.memory_space<vmem>>, %arg4: memref<1x16x128xf32, #tpu.memory_space<vmem>>) attributes {dimension_semantics = [#tpu.dimension_semantics<parallel>, #tpu.dimension_semantics<arbitrary>], iteration_bounds = array<i64: 1, 1>, scalar_prefetch = 0 : i64, scratch_operands = 0 : i64, tpu.core_type = #tpu.core_type<tc>, window_params = [{transform_indices = @transform_0, window_bounds = array<i64: 16, 128>}, {transform_indices = @transform_1, window_bounds = array<i64: 16, 128>}, {transform_indices = @transform_2, window_bounds = array<i64: 1, 16, 128>}]} {
    %c0_i32 = arith.constant 0 : i32
    %0 = arith.cmpi eq, %arg1, %c0_i32 : i32
    %1 = arith.extui %0 : i1 to i32
    %c0_i32_0 = arith.constant 0 : i32
    %2 = arith.cmpi ne, %1, %c0_i32_0 : i32
    scf.if %2 {
      %cst_11 = arith.constant 0.000000e+00 : f32
      %16 = vector.broadcast %cst_11 : f32 to vector<1x16x128xf32>
      %c0_12 = arith.constant 0 : index
      %c0_13 = arith.constant 0 : index
      %c0_14 = arith.constant 0 : index
      %17 = vector.load %arg4[%c0_12, %c0_13, %c0_14] : memref<1x16x128xf32, #tpu.memory_space<vmem>>, vector<1x16x128xf32>
      tpu.vector_store %arg4[%c0_12, %c0_13, %c0_14], %16 {strides = array<i32>} : memref<1x16x128xf32, #tpu.memory_space<vmem>>, vector<1x16x128xf32>,
    } else {
    }
    %c0 = arith.constant 0 : index
    %c0_1 = arith.constant 0 : index
    %3 = vector.load %arg2[%c0, %c0_1] : memref<16x128xf32, #tpu.memory_space<vmem>>, vector<16x128xf32>
    %c0_2 = arith.constant 0 : index
    %c0_3 = arith.constant 0 : index
    %4 = vector.load %arg3[%c0_2, %c0_3] : memref<16x128xf32, #tpu.memory_space<vmem>>, vector<16x128xf32>
    %5 = arith.subf %3, %4 : vector<16x128xf32>
    %6 = arith.mulf %5, %5 : vector<16x128xf32>
    %cst = arith.constant 9.99999997E-7 : f32
    %7 = vector.broadcast %cst : f32 to vector<16x128xf32>
    %8 = arith.addf %6, %7 : vector<16x128xf32>
    %9 = math.sqrt %8 : vector<16x128xf32>
    %c0_4 = arith.constant 0 : index
    %c0_5 = arith.constant 0 : index
    %c0_6 = arith.constant 0 : index
    %10 = vector.load %arg4[%c0_4, %c0_5, %c0_6] : memref<1x16x128xf32, #tpu.memory_space<vmem>>, vector<1x16x128xf32>
    %11 = vector.shape_cast %9 : vector<16x128xf32> to vector<1x16x128xf32>
    %cst_7 = arith.constant dense<0.000000e+00> : vector<16x128xf32>
    %12 = vector.multi_reduction <add>, %11, %cst_7 [0] : vector<1x16x128xf32> to vector<16x128xf32>
    %13 = vector.shape_cast %12 : vector<16x128xf32> to vector<1x16x128xf32>
    %14 = arith.addf %10, %13 : vector<1x16x128xf32>
    %c0_8 = arith.constant 0 : index
    %c0_9 = arith.constant 0 : index
    %c0_10 = arith.constant 0 : index
    %15 = vector.load %arg4[%c0_8, %c0_9, %c0_10] : memref<1x16x128xf32, #tpu.memory_space<vmem>>, vector<1x16x128xf32>
    tpu.vector_store %arg4[%c0_8, %c0_9, %c0_10], %14 {strides = array<i32>} : memref<1x16x128xf32, #tpu.memory_space<vmem>>, vector<1x16x128xf32>,
    return
  }
  func.func @transform_0(%arg0: i32, %arg1: i32) -> (i32, i32) {
    %c1_i32 = arith.constant 1 : i32
    %0 = arith.muli %arg0, %c1_i32 : i32
    %1 = arith.addi %0, %arg1 : i32
    %c0_i32 = arith.constant 0 : i32
    %c0_i32_0 = arith.constant 0 : i32
    return %1, %c0_i32 : i32, i32
  }
  func.func @transform_1(%arg0: i32, %arg1: i32) -> (i32, i32) {
    %c1_i32 = arith.constant 1 : i32
    %0 = arith.muli %arg0, %c1_i32 : i32
    %1 = arith.addi %0, %arg1 : i32
    %c0_i32 = arith.constant 0 : i32
    %c0_i32_0 = arith.constant 0 : i32
    return %1, %c0_i32 : i32, i32
  }
  func.func @transform_2(%arg0: i32, %arg1: i32) -> (i32, i32, i32) {
    %c0_i32 = arith.constant 0 : i32
    %c0_i32_0 = arith.constant 0 : i32
    %c0_i32_1 = arith.constant 0 : i32
    return %arg0, %c0_i32, %c0_i32_0 : i32, i32, i32
  }
}

</mosaic_0001>

<bundles_post_ra>
// kernel: charbonnier_loss.1
= control target key start
LH: loop header
LB: loop body
LE: loop exit
PB: predicated region body
PF: predicated region fallthrough
CT: control target
= control target key end

     0   :  { %s147_s0 = inlined_call_operand.vmem [shape: f32[16,128], index: 0, kind: input, shape index: {}]   ;;  %s148_s1 = inlined_call_operand.vmem [shape: f32[16,128], index: 1, kind: input, shape index: {}]   ;;  %s149_s2 = inlined_call_operand.vmem [shape: f32[1,16,128], index: 2, kind: output, shape index: {}]  }
   0x1   :  { %v61_v0 = vld [vmem:[%s147_s0] sm:$0xff]  ;;  %v62_v2 = vld [vmem:[%s147_s0 + $0x8] sm:$0xff] }
   0x2   :  { %v63_v1 = vld [vmem:[%s148_s1] sm:$0xff]  ;;  %v64_v4 = vld [vmem:[%s148_s1 + $0x8] sm:$0xff] }
   0x3   :  { %v65_v3 = vsub.f32 %v61_v0, %v63_v1  ;;  %v66_v5 = vsub.f32 %v62_v2, %v64_v4 }
   0x5   :  { %v67_v6 = vmul.f32 %v65_v3, %v65_v3  ;;  %v68_v7 = vmul.f32 %v66_v5, %v66_v5 }
   0x7   :  { %v69_v8 = vadd.f32 1e-06, %v67_v6  ;;  %v70_v9 = vadd.f32 1e-06, %v68_v7 }
   0x9   :  { %110 = vrsqrt.f32 %v69_v8  ;;  %vm73_vm0 = vcmp.eq.f32.partialorder %v69_v8, inf  ;;  %v76_v11 = vand.u32 2147483648, %v69_v8  ;;  %vm75_vm1 = vcmp.eq.f32.partialorder %v69_v8, 0.0 }
   0xa   :  { %112 = vrsqrt.f32 %v70_v9  ;;  %vm80_vm2 = vcmp.eq.f32.partialorder %v70_v9, inf  ;;  %v83_v14 = vand.u32 2147483648, %v70_v9  ;;  %vm82_vm3 = vcmp.eq.f32.partialorder %v70_v9, 0.0 }
  0x16   :  { %v111_v10 = vpop.eup %110 }
  0x17   :  { %v113_v12 = vpop.eup %112  ;;  %v72_v13 = vmul.f32 %v111_v10, %v69_v8 }
  0x18   :  { %v79_v15 = vmul.f32 %v113_v12, %v70_v9 }
  0x19   :  { %v74_v16 = vsel %vm73_vm0, %v69_v8, %v72_v13 }
  0x1a   :  { %v77_v17 = vsel %vm75_vm1, %v76_v11, %v74_v16  ;;  %v81_v18 = vsel %vm80_vm2, %v70_v9, %v79_v15 }
  0x1b   :  { %v84_v19 = vsel %vm82_vm3, %v83_v14, %v81_v18  ;;  %91 = vst [vmem:[%s149_s2] sm:$0xff] %v77_v17 }
  0x1c   :  { %92 = vst [vmem:[%s149_s2 + $0x8] sm:$0xff] %v84_v19 }

</bundles_post_ra>
